<compile_context>
chip_gen: v5e
topology: v5e:2x2
jax: 0.10.0
libtpu: 0.0.40
codegen_flags: <defaults>
</compile_context>

<pallas_src>
import functools

import jax
import jax.numpy as jnp
from jax.experimental import pallas as pl
from jax.experimental.pallas import tpu as pltpu

_LANE = 128      # lane width (last dim of a vreg)
_SUBLANE = 8     # sublane count (second-to-last dim of a vreg)


def _round_up(x, m):
    return ((x + m - 1) // m) * m


def _mlp_kernel(x_ref,
                w1_ref, b1_ref,
                w2_ref, b2_ref,
                w3_ref, b3_ref,
                wo_ref, bo_ref,
                out_ref):
    """Fused forward: 3x (Linear + ReLU) + output Linear, all lane-dense (128-mult)."""
    x = x_ref[...]

    h = jnp.dot(x, w1_ref[...], preferred_element_type=jnp.float32) + b1_ref[...]
    h = jnp.maximum(h, 0.0)

    h = jnp.dot(h, w2_ref[...], preferred_element_type=jnp.float32) + b2_ref[...]
    h = jnp.maximum(h, 0.0)

    h = jnp.dot(h, w3_ref[...], preferred_element_type=jnp.float32) + b3_ref[...]
    h = jnp.maximum(h, 0.0)

    out = jnp.dot(h, wo_ref[...], preferred_element_type=jnp.float32) + bo_ref[...]
    out_ref[...] = out.astype(out_ref.dtype)


def init_qnetwork_params(key, state_size, action_size, hidden_layer=(200, 100, 20)):
    """Deterministic init mimicking torch.nn.Linear default (U(-1/sqrt(in), 1/sqrt(in))).
    Weights stored transposed relative to PyTorch: (in_features, out_features)."""
    dims = [state_size] + list(hidden_layer) + [action_size]
    params = []
    for i in range(len(dims) - 1):
        fan_in, fan_out = dims[i], dims[i + 1]
        key, kw, kb = jax.random.split(key, 3)
        bound = 1.0 / (fan_in ** 0.5)
        w = jax.random.uniform(kw, (fan_in, fan_out), jnp.float32, -bound, bound)
        b = jax.random.uniform(kb, (1, fan_out), jnp.float32, -bound, bound)
        params.append((w, b))
    return params


def pad_qnetwork_params(params):
    """Zero-pad every (in, out) weight and (1, out) bias so both dims are
    multiples of 128. Exact: padded input lanes are zero, padded weight rows/cols
    are zero, padded bias lanes are zero, and ReLU keeps them zero."""
    padded = []
    for (w, b) in params:
        fi, fo = w.shape
        fi_p = _round_up(fi, _LANE)
        fo_p = _round_up(fo, _LANE)
        wp = jnp.zeros((fi_p, fo_p), jnp.float32).at[:fi, :fo].set(w)
        bp = jnp.zeros((1, fo_p), jnp.float32).at[:, :fo].set(b)
        padded.append((wp, bp))
    return padded


@functools.partial(jax.jit, static_argnames=("action_size", "block_batch"))
def qnetwork_forward(x, padded_params, *, action_size, block_batch=512):
    """x: (batch, state_size) f32. padded_params: output of pad_qnetwork_params.
    Returns (batch, action_size) f32."""
    (w1, b1), (w2, b2), (w3, b3), (wo, bo) = padded_params
    batch, feat = x.shape
    in_pad = w1.shape[0]
    out_pad = wo.shape[1]

    # Batch tile: multiple of 8 sublanes, capped so double-buffered x/out tiles +
    # intermediates stay far under v7x's 64 MiB VMEM (weights are ~<1 MiB padded).
    tb = min(block_batch, _round_up(batch, _SUBLANE))
    b_pad = _round_up(batch, tb)

    # Zero-pad x to (b_pad, in_pad): lane-dense input, padded rows give padded
    # (discarded) output rows.
    xp = jnp.zeros((b_pad, in_pad), jnp.float32).at[:batch, :feat].set(x)

    grid = (b_pad // tb,)

    def const_map(i):  # weights/biases: single block resident across all grid steps
        return (0, 0)

    out = pl.pallas_call(
        _mlp_kernel,
        out_shape=jax.ShapeDtypeStruct((b_pad, out_pad), jnp.float32),
        grid=grid,
        in_specs=[
            pl.BlockSpec((tb, in_pad), lambda i: (i, 0)),          # x tile
            pl.BlockSpec(w1.shape, const_map), pl.BlockSpec(b1.shape, const_map),
            pl.BlockSpec(w2.shape, const_map), pl.BlockSpec(b2.shape, const_map),
            pl.BlockSpec(w3.shape, const_map), pl.BlockSpec(b3.shape, const_map),
            pl.BlockSpec(wo.shape, const_map), pl.BlockSpec(bo.shape, const_map),
        ],
        out_specs=pl.BlockSpec((tb, out_pad), lambda i: (i, 0)),   # out tile
        compiler_params=pltpu.CompilerParams(
            # batch axis is independent -> shard across the 2 TCs on v7x
            dimension_semantics=("parallel",),
        ),
    )(xp, w1, b1, w2, b2, w3, b3, wo, bo)

    return out[:batch, :action_size]


def qnetwork_reference(x, params):
    """Pure-JAX reference of the PyTorch forward pass (unpadded params)."""
    h = x
    for (w, b) in params[:-1]:
        h = jnp.maximum(h @ w + b, 0.0)
    wo, bo = params[-1]
    return h @ wo + bo


if __name__ == "__main__":
    state_size = 16
    action_size = 4
    batch = 8

    key = jax.random.PRNGKey(0)
    key, kx = jax.random.split(key)
    x = jax.random.normal(kx, (batch, state_size), jnp.float32)

    params = init_qnetwork_params(key, state_size, action_size)
    padded_params = pad_qnetwork_params(params)   # one-time parameter prep

    out = qnetwork_forward(x, padded_params, action_size=action_size)
    out = jax.block_until_ready(out)

    ref = qnetwork_reference(x, params)
    assert out.shape == (batch, action_size)
    assert jnp.allclose(out, ref, atol=1e-4, rtol=1e-4)

    print("KERNEL_OK")
</pallas_src>

<mosaic_0001>
module attributes {stable_mosaic.version = 11 : i64} {
  func.func @_mlp_kernel(%arg0: i32, %arg1: memref<8x128xf32, #tpu.memory_space<vmem>>, %arg2: memref<128x256xf32, #tpu.memory_space<vmem>>, %arg3: memref<1x256xf32, #tpu.memory_space<vmem>>, %arg4: memref<256x128xf32, #tpu.memory_space<vmem>>, %arg5: memref<1x128xf32, #tpu.memory_space<vmem>>, %arg6: memref<128x128xf32, #tpu.memory_space<vmem>>, %arg7: memref<1x128xf32, #tpu.memory_space<vmem>>, %arg8: memref<128x128xf32, #tpu.memory_space<vmem>>, %arg9: memref<1x128xf32, #tpu.memory_space<vmem>>, %arg10: memref<8x128xf32, #tpu.memory_space<vmem>>) attributes {dimension_semantics = [#tpu.dimension_semantics<parallel>], iteration_bounds = array<i64: 1>, scalar_prefetch = 0 : i64, scratch_operands = 0 : i64, tpu.core_type = #tpu.core_type<tc>, window_params = [{transform_indices = @transform_0, window_bounds = array<i64: 8, 128>}, {pipeline_mode = #tpu.pipeline_mode<synchronous>, transform_indices = @transform_1, window_bounds = array<i64: 128, 256>}, {pipeline_mode = #tpu.pipeline_mode<synchronous>, transform_indices = @transform_2, window_bounds = array<i64: 1, 256>}, {pipeline_mode = #tpu.pipeline_mode<synchronous>, transform_indices = @transform_3, window_bounds = array<i64: 256, 128>}, {pipeline_mode = #tpu.pipeline_mode<synchronous>, transform_indices = @transform_4, window_bounds = array<i64: 1, 128>}, {pipeline_mode = #tpu.pipeline_mode<synchronous>, transform_indices = @transform_5, window_bounds = array<i64: 128, 128>}, {pipeline_mode = #tpu.pipeline_mode<synchronous>, transform_indices = @transform_6, window_bounds = array<i64: 1, 128>}, {pipeline_mode = #tpu.pipeline_mode<synchronous>, transform_indices = @transform_7, window_bounds = array<i64: 128, 128>}, {pipeline_mode = #tpu.pipeline_mode<synchronous>, transform_indices = @transform_8, window_bounds = array<i64: 1, 128>}, {transform_indices = @transform_9, window_bounds = array<i64: 8, 128>}]} {
    %c0 = arith.constant 0 : index
    %c0_0 = arith.constant 0 : index
    %0 = vector.load %arg1[%c0, %c0_0] : memref<8x128xf32, #tpu.memory_space<vmem>>, vector<8x128xf32>
    %c0_1 = arith.constant 0 : index
    %c0_2 = arith.constant 0 : index
    %1 = vector.load %arg2[%c0_1, %c0_2] : memref<128x256xf32, #tpu.memory_space<vmem>>, vector<128x256xf32>
    %cst = arith.constant dense<0.000000e+00> : vector<8x256xf32>
    %2 = tpu.matmul %0, %1, %cst {dimension_numbers = #tpu.dot_dimension_numbers<[1], [0], [0], [1], [0, 0, 1, 1], [], []>} : vector<8x128xf32>, vector<128x256xf32>, vector<8x256xf32> -> vector<8x256xf32>
    %c0_3 = arith.constant 0 : index
    %c0_4 = arith.constant 0 : index
    %3 = vector.load %arg3[%c0_3, %c0_4] : memref<1x256xf32, #tpu.memory_space<vmem>>, vector<1x256xf32>
    %4 = vector.broadcast %3 : vector<1x256xf32> to vector<8x256xf32>
    %5 = arith.addf %2, %4 : vector<8x256xf32>
    %cst_5 = arith.constant 0.000000e+00 : f32
    %6 = vector.broadcast %cst_5 : f32 to vector<8x256xf32>
    %7 = arith.maximumf %5, %6 : vector<8x256xf32>
    %c0_6 = arith.constant 0 : index
    %c0_7 = arith.constant 0 : index
    %8 = vector.load %arg4[%c0_6, %c0_7] : memref<256x128xf32, #tpu.memory_space<vmem>>, vector<256x128xf32>
    %cst_8 = arith.constant dense<0.000000e+00> : vector<8x128xf32>
    %9 = tpu.matmul %7, %8, %cst_8 {dimension_numbers = #tpu.dot_dimension_numbers<[1], [0], [0], [1], [0, 0, 1, 1], [], []>} : vector<8x256xf32>, vector<256x128xf32>, vector<8x128xf32> -> vector<8x128xf32>
    %c0_9 = arith.constant 0 : index
    %c0_10 = arith.constant 0 : index
    %10 = vector.load %arg5[%c0_9, %c0_10] : memref<1x128xf32, #tpu.memory_space<vmem>>, vector<1x128xf32>
    %11 = vector.broadcast %10 : vector<1x128xf32> to vector<8x128xf32>
    %12 = arith.addf %9, %11 : vector<8x128xf32>
    %cst_11 = arith.constant 0.000000e+00 : f32
    %13 = vector.broadcast %cst_11 : f32 to vector<8x128xf32>
    %14 = arith.maximumf %12, %13 : vector<8x128xf32>
    %c0_12 = arith.constant 0 : index
    %c0_13 = arith.constant 0 : index
    %15 = vector.load %arg6[%c0_12, %c0_13] : memref<128x128xf32, #tpu.memory_space<vmem>>, vector<128x128xf32>
    %cst_14 = arith.constant dense<0.000000e+00> : vector<8x128xf32>
    %16 = tpu.matmul %14, %15, %cst_14 {dimension_numbers = #tpu.dot_dimension_numbers<[1], [0], [0], [1], [0, 0, 1, 1], [], []>} : vector<8x128xf32>, vector<128x128xf32>, vector<8x128xf32> -> vector<8x128xf32>
    %c0_15 = arith.constant 0 : index
    %c0_16 = arith.constant 0 : index
    %17 = vector.load %arg7[%c0_15, %c0_16] : memref<1x128xf32, #tpu.memory_space<vmem>>, vector<1x128xf32>
    %18 = vector.broadcast %17 : vector<1x128xf32> to vector<8x128xf32>
    %19 = arith.addf %16, %18 : vector<8x128xf32>
    %cst_17 = arith.constant 0.000000e+00 : f32
    %20 = vector.broadcast %cst_17 : f32 to vector<8x128xf32>
    %21 = arith.maximumf %19, %20 : vector<8x128xf32>
    %c0_18 = arith.constant 0 : index
    %c0_19 = arith.constant 0 : index
    %22 = vector.load %arg8[%c0_18, %c0_19] : memref<128x128xf32, #tpu.memory_space<vmem>>, vector<128x128xf32>
    %cst_20 = arith.constant dense<0.000000e+00> : vector<8x128xf32>
    %23 = tpu.matmul %21, %22, %cst_20 {dimension_numbers = #tpu.dot_dimension_numbers<[1], [0], [0], [1], [0, 0, 1, 1], [], []>} : vector<8x128xf32>, vector<128x128xf32>, vector<8x128xf32> -> vector<8x128xf32>
    %c0_21 = arith.constant 0 : index
    %c0_22 = arith.constant 0 : index
    %24 = vector.load %arg9[%c0_21, %c0_22] : memref<1x128xf32, #tpu.memory_space<vmem>>, vector<1x128xf32>
    %25 = vector.broadcast %24 : vector<1x128xf32> to vector<8x128xf32>
    %26 = arith.addf %23, %25 : vector<8x128xf32>
    %c0_23 = arith.constant 0 : index
    %c0_24 = arith.constant 0 : index
    %27 = vector.load %arg10[%c0_23, %c0_24] : memref<8x128xf32, #tpu.memory_space<vmem>>, vector<8x128xf32>
    tpu.vector_store %arg10[%c0_23, %c0_24], %26 {strides = array<i32>} : memref<8x128xf32, #tpu.memory_space<vmem>>, vector<8x128xf32>,
    return
  }
  func.func @transform_0(%arg0: i32) -> (i32, i32) {
    %c0_i32 = arith.constant 0 : i32
    %c0_i32_0 = arith.constant 0 : i32
    return %arg0, %c0_i32 : i32, i32
  }
  func.func @transform_1(%arg0: i32) -> (i32, i32) {
    %c0_i32 = arith.constant 0 : i32
    %c0_i32_0 = arith.constant 0 : i32
    %c0_i32_1 = arith.constant 0 : i32
    return %c0_i32, %c0_i32_0 : i32, i32
  }
  func.func @transform_2(%arg0: i32) -> (i32, i32) {
    %c0_i32 = arith.constant 0 : i32
    %c0_i32_0 = arith.constant 0 : i32
    %c0_i32_1 = arith.constant 0 : i32
    return %c0_i32, %c0_i32_0 : i32, i32
  }
  func.func @transform_3(%arg0: i32) -> (i32, i32) {
    %c0_i32 = arith.constant 0 : i32
    %c0_i32_0 = arith.constant 0 : i32
    %c0_i32_1 = arith.constant 0 : i32
    return %c0_i32, %c0_i32_0 : i32, i32
  }
  func.func @transform_4(%arg0: i32) -> (i32, i32) {
    %c0_i32 = arith.constant 0 : i32
    %c0_i32_0 = arith.constant 0 : i32
    %c0_i32_1 = arith.constant 0 : i32
    return %c0_i32, %c0_i32_0 : i32, i32
  }
  func.func @transform_5(%arg0: i32) -> (i32, i32) {
    %c0_i32 = arith.constant 0 : i32
    %c0_i32_0 = arith.constant 0 : i32
    %c0_i32_1 = arith.constant 0 : i32
    return %c0_i32, %c0_i32_0 : i32, i32
  }
  func.func @transform_6(%arg0: i32) -> (i32, i32) {
    %c0_i32 = arith.constant 0 : i32
    %c0_i32_0 = arith.constant 0 : i32
    %c0_i32_1 = arith.constant 0 : i32
    return %c0_i32, %c0_i32_0 : i32, i32
  }
  func.func @transform_7(%arg0: i32) -> (i32, i32) {
    %c0_i32 = arith.constant 0 : i32
    %c0_i32_0 = arith.constant 0 : i32
    %c0_i32_1 = arith.constant 0 : i32
    return %c0_i32, %c0_i32_0 : i32, i32
  }
  func.func @transform_8(%arg0: i32) -> (i32, i32) {
    %c0_i32 = arith.constant 0 : i32
    %c0_i32_0 = arith.constant 0 : i32
    %c0_i32_1 = arith.constant 0 : i32
    return %c0_i32, %c0_i32_0 : i32, i32
  }
  func.func @transform_9(%arg0: i32) -> (i32, i32) {
    %c0_i32 = arith.constant 0 : i32
    %c0_i32_0 = arith.constant 0 : i32
    return %arg0, %c0_i32 : i32, i32
  }
}

</mosaic_0001>

<bundles_post_ra>
// kernel: qnetwork_forward.1
= control target key start
LH: loop header
LB: loop body
LE: loop exit
PB: predicated region body
PF: predicated region fallthrough
CT: control target
= control target key end

     0   :  { %14 = vsyncpa [#allocation3], 0  ;;  %s543_s0 = inlined_call_operand.vmem [shape: f32[8,128], index: 0, kind: input, shape index: {}]   ;;  %s544_s1 = inlined_call_operand.hbm [shape: f32[128,256], index: 1, kind: input, shape index: {}]   ;;  %s545_s2 = inlined_call_operand.vmem [shape: f32[1,256], index: 2, kind: input, shape index: {}]   ;;  %s546_s3 = inlined_call_operand.hbm [shape: f32[256,128], index: 3, kind: input, shape index: {}]   ;;  %s547_s4 = inlined_call_operand.vmem [shape: f32[1,128], index: 4, kind: input, shape index: {}]   ;;  %s548_s5 = inlined_call_operand.hbm [shape: f32[128,128], index: 5, kind: input, shape index: {}]   ;;  %s549_s6 = inlined_call_operand.vmem [shape: f32[1,128], index: 6, kind: input, shape index: {}]   ;;  %s550_s7 = inlined_call_operand.hbm [shape: f32[128,128], index: 7, kind: input, shape index: {}]   ;;  %s551_s8 = inlined_call_operand.vmem [shape: f32[1,128], index: 8, kind: input, shape index: {}]   ;;  %s552_s9 = inlined_call_operand.vmem [shape: f32[8,128], index: 9, kind: output, shape index: {}]  }
   0x1   :  { %15 = vsyncpa [#allocation5], 0  ;;  %s38_s11 = sshll.u32 %s546_s3, 4  ;;  %s39_s11 = int_to_ptr.hbm [resolvable:$true] %s38_s11 }
   0x2   :  { %16 = vsyncpa [#allocation8], 0  ;;  %s455_s12 = smov [#allocation4]   ;;  %s23_s16 = sshll.u32 %s544_s1, 4  ;;  %s24_s16 = int_to_ptr.hbm [resolvable:$true] %s23_s16 }
   0x3   :  { %s40_s13 = sshll.u32 %s455_s12, 4  ;;  %s456_s17 = smov 128   ;;  %s41_s13 = int_to_ptr.vmem [resolvable:$true] %s40_s13 }
   0x4   :  { %s457_s18 = smov 8   ;;  %s458_s19 = smov [#allocation2]  }
   0x5   :  { %46 = dma.hbm_to_vmem [thread:$0]  %s39_s11, 4096, %s41_s13, [#allocation5], %s456_s17, %s456_s17, %s457_s18  }
   0x6   :  { %s25_s20 = sshll.u32 %s458_s19, 4  ;;  %s459_s21 = smov 256   ;;  %s26_s20 = int_to_ptr.vmem [resolvable:$true] %s25_s20 }
   0x7   :  { %s460_s22 = smov 16   ;;  %s53_s24 = sshll.u32 %s548_s5, 4  ;;  %s54_s24 = int_to_ptr.hbm [resolvable:$true] %s53_s24 }
   0x8   :  { %31 = dma.hbm_to_vmem [thread:$0]  %s24_s16, 4096, %s26_s20, [#allocation3], %s459_s21, %s459_s21, %s460_s22  }
   0x9   :  { %s461_s25 = smov [#allocation6]   ;;  %s68_s28 = sshll.u32 %s550_s7, 4  ;;  %s69_s28 = int_to_ptr.hbm [resolvable:$true] %s68_s28 }
   0xa   :  { %s55_s26 = sshll.u32 %s461_s25, 4  ;;  %s462_s29 = smov [#allocation7]   ;;  %s56_s26 = int_to_ptr.vmem [resolvable:$true] %s55_s26 }
   0xb   :  { %61 = dma.hbm_to_vmem [thread:$0]  %s54_s24, 2048, %s56_s26, [#allocation5], %s456_s17, %s456_s17, %s457_s18  }
   0xc   :  { %s70_s30 = sshll.u32 %s462_s29, 4  ;;  %s71_s30 = int_to_ptr.vmem [resolvable:$true] %s70_s30 }
   0xd   :  { %76 = dma.hbm_to_vmem [thread:$0]  %s69_s28, 2048, %s71_s30, [#allocation8], %s456_s17, %s456_s17, %s457_s18  }
   0xe   :  { %449 = dma.done.wait [#allocation3], 4096  }
   0xf   :  { %450 = vsyncadd [#allocation3], 4294963200 }
  0x10   :  { %451 = dma.done.wait [#allocation5], 6144  }
  0x11   :  { %452 = vsyncadd [#allocation5], 4294961152 }
  0x12   :  { %453 = dma.done.wait [#allocation8], 2048  }
  0x13   :  { %454 = vsyncadd [#allocation8], 4294965248  ;;  %v126_v0 = vld [vmem:[#allocation2 + $0xf0] sm:$0xff]  ;;  %v124_v1 = vld [vmem:[#allocation2 + $0xe0] sm:$0xff] }
  0x14   :  { %v127_v2 = vld [vmem:[#allocation2 + $0xf8] sm:$0xff]  ;;  %134 = vmatpush.msra.mxu0 %v126_v0  ;;  %v125_v3 = vld [vmem:[#allocation2 + $0xe8] sm:$0xff]  ;;  %v122_v4 = vld [vmem:[#allocation2 + $0xd0] sm:$0xff] }
  0x15   :  { %154 = vmatpush.msra.mxu1 %v127_v2  ;;  %v123_v5 = vld [vmem:[#allocation2 + $0xd8] sm:$0xff]  ;;  %v120_v6 = vld [vmem:[#allocation2 + $0xc0] sm:$0xff]  ;;  %v121_v7 = vld [vmem:[#allocation2 + $0xc8] sm:$0xff] }
  0x16   :  { %135 = vmatpush.msra.mxu0 %v124_v1  ;;  %v118_v8 = vld [vmem:[#allocation2 + $0xb0] sm:$0xff]  ;;  %v119_v9 = vld [vmem:[#allocation2 + $0xb8] sm:$0xff]  ;;  %v116_v10 = vld [vmem:[#allocation2 + $0xa0] sm:$0xff] }
  0x17   :  { %155 = vmatpush.msra.mxu1 %v125_v3  ;;  %v117_v11 = vld [vmem:[#allocation2 + $0xa8] sm:$0xff]  ;;  %v114_v12 = vld [vmem:[#allocation2 + $0x90] sm:$0xff]  ;;  %v115_v13 = vld [vmem:[#allocation2 + $0x98] sm:$0xff] }
  0x18   :  { %136 = vmatpush.msra.mxu0 %v122_v4  ;;  %v191_v14 = vld [vmem:[#allocation4 + $0x78] sm:$0xff]  ;;  %v190_v15 = vld [vmem:[#allocation4 + $0x70] sm:$0xff]  ;;  %v112_v17 = vld [vmem:[#allocation2 + $0x80] sm:$0xff] }
  0x19   :  { %156 = vmatpush.msra.mxu1 %v123_v5  ;;  %v207_v16 = vld [vmem:[#allocation4 + $0xf8] sm:$0xff]  ;;  %v113_v18 = vld [vmem:[#allocation2 + $0x88] sm:$0xff]  ;;  %212 = vmatpush.msra.mxu2 %v191_v14  ;;  %v206_v19 = vld [vmem:[#allocation4 + $0xf0] sm:$0xff] }
  0x1a   :  { %137 = vmatpush.msra.mxu0 %v120_v6  ;;  %232 = vmatpush.msra.mxu3 %v207_v16  ;;  %v189_v20 = vld [vmem:[#allocation4 + $0x68] sm:$0xff]  ;;  %v110_v22 = vld [vmem:[#allocation2 + $0x70] sm:$0xff]  ;;  %v111_v23 = vld [vmem:[#allocation2 + $0x78] sm:$0xff] }
  0x1b   :  { %157 = vmatpush.msra.mxu1 %v121_v7  ;;  %v205_v21 = vld [vmem:[#allocation4 + $0xe8] sm:$0xff]  ;;  %213 = vmatpush.msra.mxu2 %v190_v15  ;;  %v188_v24 = vld [vmem:[#allocation4 + $0x60] sm:$0xff]  ;;  %v187_v28 = vld [vmem:[#allocation4 + $0x58] sm:$0xff] }
  0x1c   :  { %138 = vmatpush.msra.mxu0 %v118_v8  ;;  %233 = vmatpush.msra.mxu3 %v206_v19  ;;  %v204_v25 = vld [vmem:[#allocation4 + $0xe0] sm:$0xff]  ;;  %v109_v27 = vld [vmem:[#allocation2 + $0x68] sm:$0xff]  ;;  %v203_v29 = vld [vmem:[#allocation4 + $0xd8] sm:$0xff] }
  0x1d   :  { %158 = vmatpush.msra.mxu1 %v119_v9  ;;  %v108_v26 = vld [vmem:[#allocation2 + $0x60] sm:$0xff]  ;;  %214 = vmatpush.msra.mxu2 %v189_v20  ;;  %v106_v30 = vld [vmem:[#allocation2 + $0x50] sm:$0xff]  ;;  %v107_v32 = vld [vmem:[#allocation2 + $0x58] sm:$0xff] }
  0x1e   :  { %139 = vmatpush.msra.mxu0 %v116_v10  ;;  %234 = vmatpush.msra.mxu3 %v205_v21  ;;  %v104_v31 = vld [vmem:[#allocation2 + $0x40] sm:$0xff]  ;;  %v186_v33 = vld [vmem:[#allocation4 + $0x50] sm:$0xff]  ;;  %v105_v35 = vld [vmem:[#allocation2 + $0x48] sm:$0xff] }
  0x1f   :  { %159 = vmatpush.msra.mxu1 %v117_v11  ;;  %215 = vmatpush.msra.mxu2 %v188_v24  ;;  %v202_v34 = vld [vmem:[#allocation4 + $0xd0] sm:$0xff]  ;;  %v185_v36 = vld [vmem:[#allocation4 + $0x48] sm:$0xff]  ;;  %v103_v39 = vld [vmem:[#allocation2 + $0x38] sm:$0xff] }
  0x20   :  { %140 = vmatpush.msra.mxu0 %v114_v12  ;;  %235 = vmatpush.msra.mxu3 %v204_v25  ;;  %v201_v37 = vld [vmem:[#allocation4 + $0xc8] sm:$0xff]  ;;  %v102_v38 = vld [vmem:[#allocation2 + $0x30] sm:$0xff]  ;;  %v184_v40 = vld [vmem:[#allocation4 + $0x40] sm:$0xff] }
  0x21   :  { %160 = vmatpush.msra.mxu1 %v115_v13  ;;  %216 = vmatpush.msra.mxu2 %v187_v28  ;;  %v200_v41 = vld [vmem:[#allocation4 + $0xc0] sm:$0xff]  ;;  %v101_v43 = vld [vmem:[#allocation2 + $0x28] sm:$0xff]  ;;  %v183_v44 = vld [vmem:[#allocation4 + $0x38] sm:$0xff] }
  0x22   :  { %141 = vmatpush.msra.mxu0 %v112_v17  ;;  %236 = vmatpush.msra.mxu3 %v203_v29  ;;  %v100_v42 = vld [vmem:[#allocation2 + $0x20] sm:$0xff]  ;;  %v199_v45 = vld [vmem:[#allocation4 + $0xb8] sm:$0xff]  ;;  %v98_v46 = vld [vmem:[#allocation2 + $0x10] sm:$0xff] }
  0x23   :  { %161 = vmatpush.msra.mxu1 %v113_v18  ;;  %217 = vmatpush.msra.mxu2 %v186_v33  ;;  %v99_v47 = vld [vmem:[#allocation2 + $0x18] sm:$0xff]  ;;  %v182_v48 = vld [vmem:[#allocation4 + $0x30] sm:$0xff]  ;;  %v96_v50 = vld [vmem:[#allocation2] sm:$0xff] }
  0x24   :  { %142 = vmatpush.msra.mxu0 %v110_v22  ;;  %237 = vmatpush.msra.mxu3 %v202_v34  ;;  %v198_v49 = vld [vmem:[#allocation4 + $0xb0] sm:$0xff]  ;;  %v97_v51 = vld [vmem:[#allocation2 + $0x8] sm:$0xff]  ;;  %v95_v52 = vld [vmem:[%s543_s0] sm:$0xff] }
  0x25   :  { %162 = vmatpush.msra.mxu1 %v111_v23  ;;  %218 = vmatpush.msra.mxu2 %v185_v36  ;;  %v181_v53 = vld [vmem:[#allocation4 + $0x28] sm:$0xff]  ;;  %v180_v55 = vld [vmem:[#allocation4 + $0x20] sm:$0xff]  ;;  %v179_v57 = vld [vmem:[#allocation4 + $0x18] sm:$0xff] }
  0x26   :  { %143 = vmatpush.msra.mxu0 %v108_v26  ;;  %238 = vmatpush.msra.mxu3 %v201_v37  ;;  %v197_v54 = vld [vmem:[#allocation4 + $0xa8] sm:$0xff]  ;;  %v196_v56 = vld [vmem:[#allocation4 + $0xa0] sm:$0xff]  ;;  %v178_v58 = vld [vmem:[#allocation4 + $0x10] sm:$0xff] }
  0x27   :  { %163 = vmatpush.msra.mxu1 %v109_v27  ;;  %219 = vmatpush.msra.mxu2 %v184_v40  ;;  %v195_v59 = vld [vmem:[#allocation4 + $0x98] sm:$0xff]  ;;  %v177_v60 = vld [vmem:[#allocation4 + $0x8] sm:$0xff]  ;;  %v194_v61 = vld [vmem:[#allocation4 + $0x90] sm:$0xff] }
  0x28   :  { %144 = vmatpush.msra.mxu0 %v106_v30  ;;  %239 = vmatpush.msra.mxu3 %v200_v41  ;;  %v176_v62 = vld [vmem:[#allocation4] sm:$0xff]  ;;  %v193_v63 = vld [vmem:[#allocation4 + $0x88] sm:$0xff]  ;;  %v268_v1 = vld [vmem:[#allocation6 + $0x78] sm:$0xff] }
  0x29   :  { %164 = vmatpush.msra.mxu1 %v107_v32  ;;  %220 = vmatpush.msra.mxu2 %v183_v44  ;;  %v192_v0 = vld [vmem:[#allocation4 + $0x80] sm:$0xff]  ;;  %v267_v2 = vld [vmem:[#allocation6 + $0x70] sm:$0xff]  ;;  %v266_v3 = vld [vmem:[#allocation6 + $0x68] sm:$0xff] }
  0x2a   :  { %145 = vmatpush.msra.mxu0 %v104_v31  ;;  %240 = vmatpush.msra.mxu3 %v199_v45  ;;  %v265_v4 = vld [vmem:[#allocation6 + $0x60] sm:$0xff]  ;;  %v264_v5 = vld [vmem:[#allocation6 + $0x58] sm:$0xff]  ;;  %v263_v6 = vld [vmem:[#allocation6 + $0x50] sm:$0xff] }
  0x2b   :  { %165 = vmatpush.msra.mxu1 %v105_v35  ;;  %221 = vmatpush.msra.mxu2 %v182_v48  ;;  %v262_v7 = vld [vmem:[#allocation6 + $0x48] sm:$0xff]  ;;  %v261_v8 = vld [vmem:[#allocation6 + $0x40] sm:$0xff]  ;;  %v260_v9 = vld [vmem:[#allocation6 + $0x38] sm:$0xff] }
  0x2c   :  { %146 = vmatpush.msra.mxu0 %v102_v38  ;;  %241 = vmatpush.msra.mxu3 %v198_v49  ;;  %v259_v10 = vld [vmem:[#allocation6 + $0x30] sm:$0xff]  ;;  %v258_v11 = vld [vmem:[#allocation6 + $0x28] sm:$0xff]  ;;  %v257_v12 = vld [vmem:[#allocation6 + $0x20] sm:$0xff] }
  0x2d   :  { %166 = vmatpush.msra.mxu1 %v103_v39  ;;  %222 = vmatpush.msra.mxu2 %v181_v53  ;;  %v128_v13 = vld [vmem:[%s545_s2] sm:$0x3]  ;;  %v256_v22 = vld [vmem:[#allocation6 + $0x18] sm:$0xff]  ;;  %v255_v23 = vld [vmem:[#allocation6 + $0x10] sm:$0xff] }
  0x2e   :  { %147 = vmatpush.msra.mxu0 %v100_v42  ;;  %242 = vmatpush.msra.mxu3 %v197_v54  ;;  %v130_v14 = vperm.slane %v128_v13, 0  ;;  %v131_v15 = vperm.slane %v128_v13, 1  ;;  %v254_v24 = vld [vmem:[#allocation6 + $0x8] sm:$0xff]  ;;  %v253_v25 = vld [vmem:[#allocation6] sm:$0xff]  ;;  %v309_v26 = vld [vmem:[#allocation7 + $0x78] sm:$0xff] }
  0x2f   :  { %167 = vmatpush.msra.mxu1 %v101_v43  ;;  %223 = vmatpush.msra.mxu2 %v180_v55  ;;  %v308_v27 = vld [vmem:[#allocation7 + $0x70] sm:$0xff]  ;;  %v307_v28 = vld [vmem:[#allocation7 + $0x68] sm:$0xff]  ;;  %v306_v29 = vld [vmem:[#allocation7 + $0x60] sm:$0xff] }
  0x30   :  { %148 = vmatpush.msra.mxu0 %v98_v46  ;;  %243 = vmatpush.msra.mxu3 %v196_v56  ;;  %v305_v30 = vld [vmem:[#allocation7 + $0x58] sm:$0xff]  ;;  %v304_v31 = vld [vmem:[#allocation7 + $0x50] sm:$0xff]  ;;  %v303_v32 = vld [vmem:[#allocation7 + $0x48] sm:$0xff] }
  0x31   :  { %168 = vmatpush.msra.mxu1 %v99_v47  ;;  %224 = vmatpush.msra.mxu2 %v179_v57  ;;  %v302_v33 = vld [vmem:[#allocation7 + $0x40] sm:$0xff]  ;;  %v301_v34 = vld [vmem:[#allocation7 + $0x38] sm:$0xff]  ;;  %v300_v35 = vld [vmem:[#allocation7 + $0x30] sm:$0xff] }
  0x32   :  { %149 = vmatpush.msra.mxu0 %v96_v50  ;;  %244 = vmatpush.msra.mxu3 %v195_v59  ;;  %v299_v36 = vld [vmem:[#allocation7 + $0x28] sm:$0xff]  ;;  %v298_v37 = vld [vmem:[#allocation7 + $0x20] sm:$0xff]  ;;  %v297_v39 = vld [vmem:[#allocation7 + $0x18] sm:$0xff] }
  0x33   :  { %169 = vmatpush.msra.mxu1 %v97_v51  ;;  %150 = vmatmul.f32.vlgmr.msra.gmra.mxu0 %v95_v52  ;;  %v350_v38 = vld [vmem:[%s547_s4] ss:$0 sm:$0xff]  ;;  %v296_v45 = vld [vmem:[#allocation7 + $0x10] sm:$0xff]  ;;  %v295_v46 = vld [vmem:[#allocation7 + $0x8] sm:$0xff] }
  0x34   :  { %170 = vmatmul.f32.vlgmr.msra.gmra.mxu1 %v95_v52  ;;  %225 = vmatpush.msra.mxu2 %v178_v58  ;;  %v294_v47 = vld [vmem:[#allocation7] sm:$0xff] }
  0x35   :  { %245 = vmatpush.msra.mxu3 %v194_v61  ;;  %273 = vmatpush.msrb.mxu0 %v268_v1  ;;  %v351_v48 = vld [vmem:[%s549_s6] ss:$0 sm:$0xff] }
  0x36   :  { %226 = vmatpush.msra.mxu2 %v177_v60  ;;  %314 = vmatpush.msrb.mxu1 %v309_v26  ;;  %v352_v52 = vld [vmem:[%s551_s8] ss:$0 sm:$0xff] }
  0x37   :  { %246 = vmatpush.msra.mxu3 %v193_v63  ;;  %274 = vmatpush.msrb.mxu0 %v267_v2 }
  0x38   :  { %227 = vmatpush.msra.mxu2 %v176_v62  ;;  %315 = vmatpush.msrb.mxu1 %v308_v27 }
  0x39   :  { %247 = vmatpush.msra.mxu3 %v192_v0  ;;  %275 = vmatpush.msrb.mxu0 %v266_v3 }
  0x3a   :  { %316 = vmatpush.msrb.mxu1 %v307_v28 }
  0x3b   :  { %276 = vmatpush.msrb.mxu0 %v265_v4 }
  0x3c   :  { %317 = vmatpush.msrb.mxu1 %v306_v29 }
  0x3d   :  { %277 = vmatpush.msrb.mxu0 %v264_v5 }
  0x3e   :  { %318 = vmatpush.msrb.mxu1 %v305_v30 }
  0x3f   :  { %278 = vmatpush.msrb.mxu0 %v263_v6 }
  0x40   :  { %319 = vmatpush.msrb.mxu1 %v304_v31 }
  0x41   :  { %279 = vmatpush.msrb.mxu0 %v262_v7 }
  0x42   :  { %320 = vmatpush.msrb.mxu1 %v303_v32 }
  0x43   :  { %280 = vmatpush.msrb.mxu0 %v261_v8 }
  0x44   :  { %321 = vmatpush.msrb.mxu1 %v302_v33 }
  0x45   :  { %281 = vmatpush.msrb.mxu0 %v260_v9 }
  0x46   :  { %322 = vmatpush.msrb.mxu1 %v301_v34 }
  0x47   :  { %282 = vmatpush.msrb.mxu0 %v259_v10 }
  0x48   :  { %323 = vmatpush.msrb.mxu1 %v300_v35 }
  0x49   :  { %283 = vmatpush.msrb.mxu0 %v258_v11 }
  0x4a   :  { %324 = vmatpush.msrb.mxu1 %v299_v36 }
  0x4b   :  { %284 = vmatpush.msrb.mxu0 %v257_v12 }
  0x4c   :  { %325 = vmatpush.msrb.mxu1 %v298_v37 }
  0x4d   :  { %285 = vmatpush.msrb.mxu0 %v256_v22 }
  0x4e   :  { %326 = vmatpush.msrb.mxu1 %v297_v39 }
  0x4f   :  { %286 = vmatpush.msrb.mxu0 %v255_v23 }
  0x50   :  { %327 = vmatpush.msrb.mxu1 %v296_v45 }
  0x51   :  { %287 = vmatpush.msrb.mxu0 %v254_v24 }
  0x52   :  { %328 = vmatpush.msrb.mxu1 %v295_v46 }
  0x53   :  { %288 = vmatpush.msrb.mxu0 %v253_v25 }
  0x54   :  { %329 = vmatpush.msrb.mxu1 %v294_v47 }
  0xb0   :  { %v151_v16 = vpop.f32.mrf.mxu0 }
  0xb1   :  { %v171_v17 = vpop.f32.mrf.mxu1  ;;  %v152_v18 = vadd.f32 %v151_v16, %v130_v14 }
  0xb2   :  { %v172_v19 = vadd.f32 %v171_v17, %v131_v15 }
  0xb3   :  { %v174_v20 = vmax.f32 %v152_v18, 0.0 }
  0xb4   :  { %v175_v21 = vmax.f32 %v172_v19, 0.0 }
  0xb5   :  { %228 = vmatmul.f32.vlgmr.msra.gmra.mxu2 %v174_v20 }
  0xb6   :  { %248 = vmatmul.f32.vlgmr.msra.gmra.mxu3 %v175_v21 }
 0x138   :  { %v229_v40 = vpop.f32.mrf.mxu2 }
 0x139   :  { %v249_v41 = vpop.f32.mrf.mxu3  ;;  %v230_v42 = vadd.f32 %v350_v38, %v229_v40 }
 0x13b   :  { %v250_v43 = vadd.f32 %v249_v41, %v230_v42 }
 0x13d   :  { %v252_v44 = vmax.f32 %v250_v43, 0.0 }
 0x13f   :  { %289 = vmatmul.f32.vlgmr.msrb.gmra.mxu0 %v252_v44 }
 0x1bc   :  { %v290_v49 = vpop.f32.mrf.mxu0 }
 0x1bd   :  { %v291_v50 = vadd.f32 %v351_v48, %v290_v49 }
 0x1bf   :  { %v293_v51 = vmax.f32 %v291_v50, 0.0 }
 0x1c1   :  { %330 = vmatmul.f32.vlgmr.msrb.gmra.mxu1 %v293_v51 }
 0x23e   :  { %v331_v53 = vpop.f32.mrf.mxu1 }
 0x23f   :  { %v332_v54 = vadd.f32 %v352_v52, %v331_v53 }
 0x241   :  { %334 = vst [vmem:[%s552_s9] sm:$0xff] %v332_v54 }
 0x242   :  { %339 = vsyncpa [#allocation3], 1 }
 0x243   :  { %340 = vsyncpa [#allocation5], 1 }
 0x244   :  { %341 = vsyncpa [#allocation8], 1 }

</bundles_post_ra>
